<compile_context>
chip_gen: v7x
topology: tpu7x:2x2x1
jax: 0.10.0
libtpu: 0.0.40
codegen_flags: <defaults>
</compile_context>

<pallas_src>
import jax
import jax.numpy as jnp
from jax.experimental import pallas as pl
from jax.experimental.pallas import tpu as pltpu

# ---- synthetic hyper-parameters consistent with the module -----------------
NUM_SEGMENTS = 8          # T (num_segments)
NUM_CLASS = 10            # num_class
FEATURE_DIM = 512         # resnet18/34 branch -> feature_dim = 512
DROPOUT = 0.3             # > 0  => new_fc path is used
C_IN, H, W = 3, 16, 16    # small spatial size for the synthetic run
P = C_IN * H * W          # flattened per-frame pixels (768, lane-aligned)
C_PAD = 128               # num_class padded to one lane width for the TPU


def temporal_kernel(x_ref, wb_ref, wfc_ref, b_ref, out_ref):
    """backbone matmul -> temporal sum (VPU) -> new_fc (1/T folded) + bias."""
    NT = x_ref.shape[0]
    N = out_ref.shape[0]
    T = NT // N
    F = wb_ref.shape[1]

    # In-kernel f32 -> bf16 cast of the input: removes a separate host-side
    # elementwise XLA launch; the VPU cast hides under the weight DMA.
    x_bf = x_ref[...].astype(jnp.bfloat16)

    # Stand-in backbone: per-frame linear feature extractor for ALL N*T frames
    # in one MXU call: (N*T, P) bf16 @ (P, F) bf16 -> (N*T, F) f32.
    # TODO(synk): the real GST/STM/TSM/ORI ResNet 3D backbone lives in external
    # modules and is not reproducible here; this deterministic linear stand-in
    # plays its role of producing (N*T, feature_dim) features.
    feats = jnp.dot(x_bf, wb_ref[...], preferred_element_type=jnp.float32)

    # Temporal reduction over T on the VPU/XLU: rows are ordered n*T + t, T=8
    # equals the f32 sublane tile and F=512 is lane-aligned, so this reshape is
    # layout-preserving and the sum is a cheap sublane reduce (no MXU pass,
    # no padded averaging matrix). The 1/T scale lives in wfc_ref (exact).
    sum_feats = feats.reshape(N, T, F).sum(axis=1)            # (N, F) f32

    # base_model's last layer is Dropout(p) -> identity at inference.
    # new_fc Linear(feature_dim, num_class) is affine, so applying it after the
    # temporal reduction is mathematically identical to per-frame FC then mean.
    logits = jnp.dot(sum_feats.astype(jnp.bfloat16), wfc_ref[...],
                     preferred_element_type=jnp.float32) + b_ref[...]

    out_ref[...] = logits


def prepare_params(wb, wfc_real, bias_real):
    """One-time weight prep (done at init, NOT per call): pad the class axis to
    a lane width, fold the 1/T mean scale into new_fc (power of two => exact),
    and cast to bf16 once so no per-call cast kernels are launched."""
    wfc_pad = (jnp.zeros((FEATURE_DIM, C_PAD), jnp.float32)
               .at[:, :NUM_CLASS].set(wfc_real))
    bias_pad = (jnp.zeros((1, C_PAD), jnp.float32)
                .at[0, :NUM_CLASS].set(bias_real))
    wb_bf = wb.astype(jnp.bfloat16)                                  # (P, F)
    wfc_bf = (wfc_pad * (1.0 / NUM_SEGMENTS)).astype(jnp.bfloat16)   # (F, C_PAD)
    return wb_bf, wfc_bf, bias_pad


def temporal_model_forward(x, wb_bf, wfc_bf, bias_pad):
    """x: (N*T, 3, H, W) float32 (PyTorch-style NCHW frame stack)."""
    NT = x.shape[0]
    assert NT % NUM_SEGMENTS == 0, "batch rows must be a multiple of num_segments"
    N = NT // NUM_SEGMENTS

    # The module's view + transpose(1, 2) is layout plumbing for its 3D-conv
    # backbone; with the per-frame linear stand-in each frame's flattened pixel
    # vector is all that matters, so we keep the native n*T+t row order. The
    # reshape below is contiguous (free); x stays f32 (cast happens in-kernel).
    x_flat = x.reshape(NT, P)                                        # (N*T, P) f32

    flops = (2 * NT * P * FEATURE_DIM          # backbone matmul
             + 2 * N * FEATURE_DIM * C_PAD)    # new_fc matmul
    bytes_accessed = (x_flat.size * 4 + wb_bf.size * 2 + wfc_bf.size * 2
                      + bias_pad.size * 4 + N * C_PAD * 4)

    out = pl.pallas_call(
        temporal_kernel,
        out_shape=jax.ShapeDtypeStruct((N, C_PAD), jnp.float32),
        # Whole problem (<1.2 MiB) fits in VMEM on v5e/v6e/v7x; grid-less call.
        # TODO(synk): at large NT, add a parallel 1-D row grid (TM~256, weights
        # resident via lambda i: (0, 0)) to use v7x's second TensorCore and
        # re-budget tiles against its 64 MiB VMEM.
        in_specs=[pl.BlockSpec(memory_space=pltpu.MemorySpace.VMEM)] * 4,
        out_specs=pl.BlockSpec(memory_space=pltpu.MemorySpace.VMEM),
        cost_estimate=pl.CostEstimate(flops=flops, transcendentals=0,
                                      bytes_accessed=bytes_accessed),
    )(x_flat, wb_bf, wfc_bf, bias_pad)

    return out[:, :NUM_CLASS]   # (N, num_class)


def _reference(x, wb, wfc_real, bias_real):
    """Pure-JAX reference of the module's forward order: per-frame backbone,
    per-frame new_fc (+bias), then temporal mean. Same bf16 operand casts."""
    NT = x.shape[0]
    N = NT // NUM_SEGMENTS
    x_flat = x.reshape(NT, P).astype(jnp.bfloat16)
    feats = jnp.dot(x_flat, wb.astype(jnp.bfloat16),
                    preferred_element_type=jnp.float32)               # (N*T, F)
    logits = jnp.dot(feats.astype(jnp.bfloat16), wfc_real.astype(jnp.bfloat16),
                     preferred_element_type=jnp.float32) + bias_real  # (N*T, C)
    logits = logits.reshape(N, NUM_SEGMENTS, NUM_CLASS).mean(axis=1)  # (N, C)
    return logits


if __name__ == "__main__":
    key = jax.random.PRNGKey(0)
    k_x, k_wb, k_fc = jax.random.split(key, 3)

    N = 2
    x = jax.random.normal(k_x, (N * NUM_SEGMENTS, C_IN, H, W), dtype=jnp.float32)

    # Deterministic parameter init (shapes dictated by the module's __init__):
    # stand-in backbone weight
    wb = jax.random.normal(k_wb, (P, FEATURE_DIM), dtype=jnp.float32) * 0.02
    # new_fc: weight ~ normal(0, std=0.001), bias = 0 (as in the module).
    wfc_real = jax.random.normal(k_fc, (FEATURE_DIM, NUM_CLASS), dtype=jnp.float32) * 0.001
    bias_real = jnp.zeros((NUM_CLASS,), dtype=jnp.float32)

    # One-time (cached) weight preparation — not repeated per forward call.
    wb_bf, wfc_bf, bias_pad = prepare_params(wb, wfc_real, bias_real)

    out = temporal_model_forward(x, wb_bf, wfc_bf, bias_pad)
    out = jax.block_until_ready(out)

    ref = _reference(x, wb, wfc_real, bias_real)
    assert out.shape == (N, NUM_CLASS), out.shape
    assert jnp.allclose(out, ref, atol=2e-3, rtol=1e-2), "mismatch vs reference"

    print("KERNEL_OK")
</pallas_src>

<mosaic_0001>
module attributes {stable_mosaic.version = 11 : i64} {
  func.func @temporal_kernel(%arg0: memref<16x768xf32, #tpu.memory_space<vmem>>, %arg1: memref<768x512xbf16, #tpu.memory_space<vmem>>, %arg2: memref<512x128xbf16, #tpu.memory_space<vmem>>, %arg3: memref<1x128xf32, #tpu.memory_space<vmem>>, %arg4: memref<2x128xf32, #tpu.memory_space<vmem>>) attributes {dimension_semantics = [], scalar_prefetch = 0 : i64, scratch_operands = 0 : i64, tpu.core_type = #tpu.core_type<tc>} {
    %c0 = arith.constant 0 : index
    %c0_0 = arith.constant 0 : index
    %0 = vector.load %arg0[%c0, %c0_0] : memref<16x768xf32, #tpu.memory_space<vmem>>, vector<16x768xf32>
    %1 = arith.truncf %0 : vector<16x768xf32> to vector<16x768xbf16>
    %c0_1 = arith.constant 0 : index
    %c0_2 = arith.constant 0 : index
    %2 = vector.load %arg1[%c0_1, %c0_2] : memref<768x512xbf16, #tpu.memory_space<vmem>>, vector<768x512xbf16>
    %cst = arith.constant dense<0.000000e+00> : vector<16x512xf32>
    %3 = tpu.matmul %1, %2, %cst {dimension_numbers = #tpu.dot_dimension_numbers<[1], [0], [0], [1], [0, 0, 1, 1], [], []>} : vector<16x768xbf16>, vector<768x512xbf16>, vector<16x512xf32> -> vector<16x512xf32>
    %4 = vector.shape_cast %3 : vector<16x512xf32> to vector<2x8x512xf32>
    %cst_3 = arith.constant dense<0.000000e+00> : vector<2x512xf32>
    %5 = vector.multi_reduction <add>, %4, %cst_3 [1] : vector<2x8x512xf32> to vector<2x512xf32>
    %6 = arith.truncf %5 : vector<2x512xf32> to vector<2x512xbf16>
    %c0_4 = arith.constant 0 : index
    %c0_5 = arith.constant 0 : index
    %7 = vector.load %arg2[%c0_4, %c0_5] : memref<512x128xbf16, #tpu.memory_space<vmem>>, vector<512x128xbf16>
    %cst_6 = arith.constant dense<0.000000e+00> : vector<2x128xf32>
    %8 = tpu.matmul %6, %7, %cst_6 {dimension_numbers = #tpu.dot_dimension_numbers<[1], [0], [0], [1], [0, 0, 1, 1], [], []>} : vector<2x512xbf16>, vector<512x128xbf16>, vector<2x128xf32> -> vector<2x128xf32>
    %c0_7 = arith.constant 0 : index
    %c0_8 = arith.constant 0 : index
    %9 = vector.load %arg3[%c0_7, %c0_8] : memref<1x128xf32, #tpu.memory_space<vmem>>, vector<1x128xf32>
    %10 = vector.broadcast %9 : vector<1x128xf32> to vector<2x128xf32>
    %11 = arith.addf %8, %10 : vector<2x128xf32>
    %c0_9 = arith.constant 0 : index
    %c0_10 = arith.constant 0 : index
    %12 = vector.load %arg4[%c0_9, %c0_10] : memref<2x128xf32, #tpu.memory_space<vmem>>, vector<2x128xf32>
    tpu.vector_store %arg4[%c0_9, %c0_10], %11 {strides = array<i32>} : memref<2x128xf32, #tpu.memory_space<vmem>>, vector<2x128xf32>,
    return
  }
}

</mosaic_0001>

<bundles_post_ra>
// kernel: tpu_custom_call.1
= control target key start
LH: loop header
LB: loop body
LE: loop exit
PB: predicated region body
PF: predicated region fallthrough
CT: control target
= control target key end

     0   :  { %9 = vsyncpa [#allocation3], 0  ;;  %s2728_s0 = inlined_call_operand.hbm [shape: f32[16,768], index: 0, kind: input, shape index: {}]   ;;  %s2729_s1 = inlined_call_operand.hbm [shape: bf16[768,512], index: 1, kind: input, shape index: {}]   ;;  %s2730_s2 = inlined_call_operand.hbm [shape: bf16[512,128], index: 2, kind: input, shape index: {}]   ;;  %s2731_s3 = inlined_call_operand.vmem [shape: f32[1,128], index: 3, kind: input, shape index: {}]   ;;  %s2732_s4 = inlined_call_operand.hbm [shape: f32[2,128], index: 4, kind: output, shape index: {}]  }
   0x1   :  { %10 = vsyncpa [#allocation6], 0 }
   0x2   :  { %11 = vsyncpa [#allocation4], 0  ;;  %s2642_s15 = smov [#allocation5]   ;;  %s2548_s19 = scalar_lea.hbm %s2729_s1, 24576 }
   0x3   :  { %s29_s16 = sshll.u32 %s2642_s15, 4  ;;  %p2549_p0 = scmp.ne.s32.totalorder %s2729_s1, %s2548_s19  ;;  %s30_s16 = int_to_ptr.vmem [resolvable:$true] %s29_s16 }
   0x4   :  { %p2552_p1 = scmp.lt.u32.totalorder %s2548_s19, %s2729_s1 }
   0x6   :  { %p2554_p2 = pnand %p2552_p1, %p2549_p0 }
   0x8   :  { %2557 = shalt.err (!%p2554_p2)
}
   0x9   :  { %s2558_s24 = scalar_lea.vmem %s30_s16, 24576  ;;  %p2563_p4 = scmp.lt.s32.totalorder %s30_s16, %s30_s16 }
   0xa   :  { %p2559_p3 = scmp.ne.s32.totalorder %s30_s16, %s2558_s24  ;;  %p2564_p5 = scmp.lt.s32.totalorder %s2558_s24, %s2558_s24 }
   0xc   :  { %p2565_p6 = por %p2564_p5, %p2563_p4 }
   0xe   :  { %p2566_p7 = pnand %p2565_p6, %p2559_p3 }
  0x10   :  { %2569 = shalt.err (!%p2566_p7)
}
  0x11   :  { %s2643_s25 = smov 256   ;;  %s2644_s26 = smov 16  }
  0x12   :  { %35 = dma.hbm_to_vmem [thread:$0]  %s2729_s1, 24576, %s30_s16, [#allocation6], %s2643_s25, %s2643_s25, %s2644_s26  }
  0x13   :  { %s2645_s29 = smov [#allocation2]   ;;  %s2570_s7 = scalar_lea.hbm %s2728_s0, 1536 }
  0x14   :  { %s17_s30 = sshll.u32 %s2645_s29, 4  ;;  %p2571_p8 = scmp.ne.s32.totalorder %s2728_s0, %s2570_s7  ;;  %s18_s30 = int_to_ptr.vmem [resolvable:$true] %s17_s30 }
  0x15   :  { %p2574_p9 = scmp.lt.u32.totalorder %s2570_s7, %s2728_s0 }
  0x17   :  { %p2576_p10 = pnand %p2574_p9, %p2571_p8 }
  0x19   :  { %2579 = shalt.err (!%p2576_p10)
}
  0x1a   :  { %s2580_s12 = scalar_lea.vmem %s18_s30, 1536  ;;  %p2585_p12 = scmp.lt.s32.totalorder %s18_s30, %s18_s30 }
  0x1b   :  { %p2581_p11 = scmp.ne.s32.totalorder %s18_s30, %s2580_s12  ;;  %p2586_p13 = scmp.lt.s32.totalorder %s2580_s12, %s2580_s12 }
  0x1d   :  { %p2587_p0 = por %p2586_p13, %p2585_p12 }
  0x1f   :  { %p2588_p1 = pnand %p2587_p0, %p2581_p11 }
  0x21   :  { %2591 = shalt.err (!%p2588_p1)
}
  0x22   :  { %s2646_s1 = smov 768   ;;  %s2647_s13 = smov 48  }
  0x23   :  { %23 = dma.hbm_to_vmem [thread:$0]  %s2728_s0, 1536, %s18_s30, [#allocation3], %s2646_s1, %s2646_s1, %s2647_s13  }
  0x24   :  { %s2648_s16 = smov [#allocation7]   ;;  %s2592_s20 = scalar_lea.hbm %s2730_s2, 4096 }
  0x25   :  { %s41_s17 = sshll.u32 %s2648_s16, 4  ;;  %p2593_p2 = scmp.ne.s32.totalorder %s2730_s2, %s2592_s20  ;;  %s42_s17 = int_to_ptr.vmem [resolvable:$true] %s41_s17 }
  0x26   :  { %p2596_p3 = scmp.lt.u32.totalorder %s2592_s20, %s2730_s2 }
  0x28   :  { %p2598_p4 = pnand %p2596_p3, %p2593_p2 }
  0x2a   :  { %2601 = shalt.err (!%p2598_p4)
}
  0x2b   :  { %s2602_s25 = scalar_lea.vmem %s42_s17, 4096  ;;  %p2607_p6 = scmp.lt.s32.totalorder %s42_s17, %s42_s17 }
  0x2c   :  { %p2603_p5 = scmp.ne.s32.totalorder %s42_s17, %s2602_s25  ;;  %p2608_p7 = scmp.lt.s32.totalorder %s2602_s25, %s2602_s25 }
  0x2e   :  { %p2609_p8 = por %p2608_p7, %p2607_p6 }
  0x30   :  { %p2610_p9 = pnand %p2609_p8, %p2603_p5 }
  0x32   :  { %2613 = shalt.err (!%p2610_p9)
}
  0x33   :  { %s2649_s0 = smov 64   ;;  %s2650_s26 = smov 4  }
  0x34   :  { %47 = dma.hbm_to_vmem [thread:$0]  %s2730_s2, 4096, %s42_s17, [#allocation6], %s2649_s0, %s2649_s0, %s2650_s26  }
  0x35   :  { %2636 = dma.done.wait [#allocation3], 1536  }
  0x36   :  { %2637 = vsyncadd [#allocation3], 4294965760 }
  0x37   :  { %2638 = dma.done.wait [#allocation6], 28672  }
  0x38   :  { %2639 = vsyncadd [#allocation6], 4294938624  ;;  %v2228_v0 = vld [vmem:[#allocation5 + $0x4] ss:$16 sps:$4 sm:$0xff]   ;;  %v2230_v1 = vld [vmem:[#allocation5 + $0xc] ss:$16 sps:$4 sm:$0xff]  }
  0x39   :  { %1230 = vmatprep.subr.bf16.mxu0 %v2228_v0  ;;  %v2232_v2 = vld [vmem:[#allocation5] ss:$16 sps:$4 sm:$0xff]   ;;  %v2233_v3 = vld [vmem:[#allocation5 + $0x8] ss:$16 sps:$4 sm:$0xff]   ;;  %1359 = vmatprep.subr.bf16.mxu1 %v2230_v1  ;;  %v2234_v4 = vld [vmem:[#allocation5 + $0x24] ss:$16 sps:$4 sm:$0xff]  }
  0x3a   :  { %1231 = vmatpush1.bf16.msra.mxu0 %v2232_v2  ;;  %1360 = vmatpush1.bf16.msra.mxu1 %v2233_v3  ;;  %v2236_v5 = vld [vmem:[#allocation5 + $0x2c] ss:$16 sps:$4 sm:$0xff]   ;;  %v2238_v6 = vld [vmem:[#allocation5 + $0x20] ss:$16 sps:$4 sm:$0xff]   ;;  %v2239_v7 = vld [vmem:[#allocation5 + $0x28] ss:$16 sps:$4 sm:$0xff]  }
  0x3b   :  { %1232 = vmatprep.subr.bf16.mxu0 %v2234_v4  ;;  %1361 = vmatprep.subr.bf16.mxu1 %v2236_v5  ;;  %v2240_v8 = vld [vmem:[#allocation5 + $0x44] ss:$16 sps:$4 sm:$0xff]   ;;  %v2242_v9 = vld [vmem:[#allocation5 + $0x4c] ss:$16 sps:$4 sm:$0xff]   ;;  %v2244_v10 = vld [vmem:[#allocation5 + $0x40] ss:$16 sps:$4 sm:$0xff]  }
  0x3c   :  { %v2245_v11 = vld [vmem:[#allocation5 + $0x48] ss:$16 sps:$4 sm:$0xff]   ;;  %v2246_v12 = vld [vmem:[#allocation5 + $0x64] ss:$16 sps:$4 sm:$0xff]   ;;  %v2248_v13 = vld [vmem:[#allocation5 + $0x6c] ss:$16 sps:$4 sm:$0xff]  }
  0x3d   :  { %v2250_v14 = vld [vmem:[#allocation5 + $0x60] ss:$16 sps:$4 sm:$0xff]   ;;  %v2251_v15 = vld [vmem:[#allocation5 + $0x68] ss:$16 sps:$4 sm:$0xff]   ;;  %v2252_v16 = vld [vmem:[#allocation5 + $0x84] ss:$16 sps:$4 sm:$0xff]  }
  0x3e   :  { %1233 = vmatpush1.bf16.msra.mxu0 %v2238_v6  ;;  %1362 = vmatpush1.bf16.msra.mxu1 %v2239_v7  ;;  %v2254_v17 = vld [vmem:[#allocation5 + $0x8c] ss:$16 sps:$4 sm:$0xff]   ;;  %v2256_v18 = vld [vmem:[#allocation5 + $0x80] ss:$16 sps:$4 sm:$0xff]   ;;  %v2257_v19 = vld [vmem:[#allocation5 + $0x88] ss:$16 sps:$4 sm:$0xff]  }
  0x3f   :  { %1234 = vmatprep.subr.bf16.mxu0 %v2240_v8  ;;  %1363 = vmatprep.subr.bf16.mxu1 %v2242_v9  ;;  %v2258_v20 = vld [vmem:[#allocation5 + $0xa4] ss:$16 sps:$4 sm:$0xff]   ;;  %v2260_v21 = vld [vmem:[#allocation5 + $0xac] ss:$16 sps:$4 sm:$0xff]   ;;  %v2262_v22 = vld [vmem:[#allocation5 + $0xa0] ss:$16 sps:$4 sm:$0xff]  }
  0x40   :  { %v2263_v23 = vld [vmem:[#allocation5 + $0xa8] ss:$16 sps:$4 sm:$0xff]   ;;  %v2264_v24 = vld [vmem:[#allocation5 + $0xc4] ss:$16 sps:$4 sm:$0xff]   ;;  %v2266_v25 = vld [vmem:[#allocation5 + $0xcc] ss:$16 sps:$4 sm:$0xff]  }
  0x41   :  { %v2268_v26 = vld [vmem:[#allocation5 + $0xc0] ss:$16 sps:$4 sm:$0xff]   ;;  %v2269_v27 = vld [vmem:[#allocation5 + $0xc8] ss:$16 sps:$4 sm:$0xff]   ;;  %v2270_v28 = vld [vmem:[#allocation5 + $0xe4] ss:$16 sps:$4 sm:$0xff]  }
  0x42   :  { %1235 = vmatpush1.bf16.msra.mxu0 %v2244_v10  ;;  %1364 = vmatpush1.bf16.msra.mxu1 %v2245_v11  ;;  %v2272_v29 = vld [vmem:[#allocation5 + $0xec] ss:$16 sps:$4 sm:$0xff]   ;;  %v2274_v30 = vld [vmem:[#allocation5 + $0xe0] ss:$16 sps:$4 sm:$0xff]   ;;  %v2275_v31 = vld [vmem:[#allocation5 + $0xe8] ss:$16 sps:$4 sm:$0xff]  }
  0x43   :  { %1236 = vmatprep.subr.bf16.mxu0 %v2246_v12  ;;  %1365 = vmatprep.subr.bf16.mxu1 %v2248_v13  ;;  %v2276_v32 = vld [vmem:[#allocation5 + $0x104] ss:$16 sps:$4 sm:$0xff]   ;;  %v2278_v33 = vld [vmem:[#allocation5 + $0x10c] ss:$16 sps:$4 sm:$0xff]   ;;  %v2280_v34 = vld [vmem:[#allocation5 + $0x100] ss:$16 sps:$4 sm:$0xff]  }
  0x44   :  { %v2281_v35 = vld [vmem:[#allocation5 + $0x108] ss:$16 sps:$4 sm:$0xff]   ;;  %v2282_v36 = vld [vmem:[#allocation5 + $0x124] ss:$16 sps:$4 sm:$0xff]   ;;  %v2284_v37 = vld [vmem:[#allocation5 + $0x12c] ss:$16 sps:$4 sm:$0xff]  }
  0x45   :  { %v2286_v38 = vld [vmem:[#allocation5 + $0x120] ss:$16 sps:$4 sm:$0xff]   ;;  %v2287_v39 = vld [vmem:[#allocation5 + $0x128] ss:$16 sps:$4 sm:$0xff]   ;;  %v2288_v40 = vld [vmem:[#allocation5 + $0x144] ss:$16 sps:$4 sm:$0xff]  }
  0x46   :  { %1237 = vmatpush1.bf16.msra.mxu0 %v2250_v14  ;;  %1366 = vmatpush1.bf16.msra.mxu1 %v2251_v15  ;;  %v2290_v41 = vld [vmem:[#allocation5 + $0x14c] ss:$16 sps:$4 sm:$0xff]   ;;  %v2292_v42 = vld [vmem:[#allocation5 + $0x140] ss:$16 sps:$4 sm:$0xff]   ;;  %v2293_v43 = vld [vmem:[#allocation5 + $0x148] ss:$16 sps:$4 sm:$0xff]  }
  0x47   :  { %1238 = vmatprep.subr.bf16.mxu0 %v2252_v16  ;;  %1367 = vmatprep.subr.bf16.mxu1 %v2254_v17  ;;  %v2294_v44 = vld [vmem:[#allocation5 + $0x164] ss:$16 sps:$4 sm:$0xff]   ;;  %v2296_v45 = vld [vmem:[#allocation5 + $0x16c] ss:$16 sps:$4 sm:$0xff]   ;;  %v2298_v48 = vld [vmem:[#allocation5 + $0x160] ss:$16 sps:$4 sm:$0xff]  }
  0x48   :  { %v61_v46 = vld [vmem:[#allocation2 + $0x8] sm:$0xff]  ;;  %v67_v47 = vld [vmem:[#allocation2 + $0x38] sm:$0xff]  ;;  %v2300_v51 = vld [vmem:[#allocation5 + $0x184] ss:$16 sps:$4 sm:$0xff]   ;;  %vm1631_vm0 = vcmask 1041409   ;;  %s2651_s30 = smov [#allocation8]  }
  0x49   :  { %v2299_v49 = vld [vmem:[#allocation5 + $0x168] ss:$16 sps:$4 sm:$0xff]   ;;  %v73_v50 = vpack.c.bf16 %v67_v47, %v61_v46  ;;  %v2302_v52 = vld [vmem:[#allocation5 + $0x18c] ss:$16 sps:$4 sm:$0xff]   ;;  %v2304_v53 = vld [vmem:[#allocation5 + $0x180] ss:$16 sps:$4 sm:$0xff]  }
  0x4a   :  { %1239 = vmatpush1.bf16.msra.mxu0 %v2256_v18  ;;  %1368 = vmatpush1.bf16.msra.mxu1 %v2257_v19  ;;  %v2305_v54 = vld [vmem:[#allocation5 + $0x188] ss:$16 sps:$4 sm:$0xff]   ;;  %v2306_v55 = vld [vmem:[#allocation5 + $0x1a4] ss:$16 sps:$4 sm:$0xff]   ;;  %v2308_v56 = vld [vmem:[#allocation5 + $0x1ac] ss:$16 sps:$4 sm:$0xff]  }
  0x4b   :  { %1240 = vmatprep.subr.bf16.mxu0 %v2258_v20  ;;  %1369 = vmatprep.subr.bf16.mxu1 %v2260_v21  ;;  %v2310_v57 = vld [vmem:[#allocation5 + $0x1a0] ss:$16 sps:$4 sm:$0xff]   ;;  %v2311_v58 = vld [vmem:[#allocation5 + $0x1a8] ss:$16 sps:$4 sm:$0xff]   ;;  %v2312_v59 = vld [vmem:[#allocation5 + $0x1c4] ss:$16 sps:$4 sm:$0xff]  }
  0x4c   :  { %1262 = vmatprep.mubr.bf16.mxu0 %v73_v50  ;;  %1391 = vmatprep.mubr.bf16.mxu1 %v73_v50  ;;  %v2314_v60 = vld [vmem:[#allocation5 + $0x1cc] ss:$16 sps:$4 sm:$0xff]   ;;  %v2316_v61 = vld [vmem:[#allocation5 + $0x1c0] ss:$16 sps:$4 sm:$0xff]   ;;  %v2317_v62 = vld [vmem:[#allocation5 + $0x1c8] ss:$16 sps:$4 sm:$0xff]  }
  0x4d   :  { %v2318_v63 = vld [vmem:[#allocation5 + $0x1e4] ss:$16 sps:$4 sm:$0xff]   ;;  %v2320_v0 = vld [vmem:[#allocation5 + $0x1ec] ss:$16 sps:$4 sm:$0xff]   ;;  %v2322_v1 = vld [vmem:[#allocation5 + $0x1e0] ss:$16 sps:$4 sm:$0xff]  }
  0x4e   :  { %1241 = vmatpush1.bf16.msra.mxu0 %v2262_v22  ;;  %1370 = vmatpush1.bf16.msra.mxu1 %v2263_v23  ;;  %v2323_v2 = vld [vmem:[#allocation5 + $0x1e8] ss:$16 sps:$4 sm:$0xff]   ;;  %v2326_v3 = vld [vmem:[#allocation5 + $0x204] ss:$16 sps:$4 sm:$0xff]   ;;  %v2329_v6 = vld [vmem:[#allocation5 + $0x20c] ss:$16 sps:$4 sm:$0xff]  }
  0x4f   :  { %1242 = vmatprep.subr.bf16.mxu0 %v2264_v24  ;;  %1371 = vmatprep.subr.bf16.mxu1 %v2266_v25  ;;  %v60_v4 = vld [vmem:[#allocation2] sm:$0xff]  ;;  %v66_v5 = vld [vmem:[#allocation2 + $0x30] sm:$0xff]  ;;  %v2327_v8 = vld [vmem:[#allocation5 + $0x208] ss:$16 sps:$4 sm:$0xff]   ;;  %s1923_s5 = sshll.u32 %s2651_s30, 4  ;;  %s1924_s5 = int_to_ptr.vmem [resolvable:$true] %s1923_s5 }
  0x50   :  { %v2324_v7 = vld [vmem:[#allocation5 + $0x200] ss:$16 sps:$4 sm:$0xff]   ;;  %v72_v9 = vpack.c.bf16 %v66_v5, %v60_v4  ;;  %v2332_v10 = vld [vmem:[#allocation5 + $0x224] ss:$16 sps:$4 sm:$0xff]   ;;  %v2335_v11 = vld [vmem:[#allocation5 + $0x22c] ss:$16 sps:$4 sm:$0xff]   ;;  %p2619_p11 = scmp.lt.s32.totalorder %s1924_s5, %s1924_s5 }
  0x51   :  { %v2330_v12 = vld [vmem:[#allocation5 + $0x220] ss:$16 sps:$4 sm:$0xff]   ;;  %v2333_v13 = vld [vmem:[#allocation5 + $0x228] ss:$16 sps:$4 sm:$0xff]   ;;  %v2338_v14 = vld [vmem:[#allocation5 + $0x244] ss:$16 sps:$4 sm:$0xff]  }
  0x52   :  { %1243 = vmatpush1.bf16.msra.mxu0 %v2268_v26  ;;  %1372 = vmatpush1.bf16.msra.mxu1 %v2269_v27  ;;  %v2341_v15 = vld [vmem:[#allocation5 + $0x24c] ss:$16 sps:$4 sm:$0xff]   ;;  %v2336_v16 = vld [vmem:[#allocation5 + $0x240] ss:$16 sps:$4 sm:$0xff]   ;;  %v2339_v17 = vld [vmem:[#allocation5 + $0x248] ss:$16 sps:$4 sm:$0xff]  }
  0x53   :  { %1244 = vmatprep.subr.bf16.mxu0 %v2270_v28  ;;  %1373 = vmatprep.subr.bf16.mxu1 %v2272_v29  ;;  %v2344_v18 = vld [vmem:[#allocation5 + $0x264] ss:$16 sps:$4 sm:$0xff]   ;;  %v2347_v19 = vld [vmem:[#allocation5 + $0x26c] ss:$16 sps:$4 sm:$0xff]   ;;  %v2342_v20 = vld [vmem:[#allocation5 + $0x260] ss:$16 sps:$4 sm:$0xff]  }
  0x54   :  { %v2345_v21 = vld [vmem:[#allocation5 + $0x268] ss:$16 sps:$4 sm:$0xff]   ;;  %v2350_v22 = vld [vmem:[#allocation5 + $0x284] ss:$16 sps:$4 sm:$0xff]   ;;  %v2353_v23 = vld [vmem:[#allocation5 + $0x28c] ss:$16 sps:$4 sm:$0xff]  }
  0x55   :  { %v2348_v24 = vld [vmem:[#allocation5 + $0x280] ss:$16 sps:$4 sm:$0xff]   ;;  %v2351_v25 = vld [vmem:[#allocation5 + $0x288] ss:$16 sps:$4 sm:$0xff]   ;;  %v2356_v26 = vld [vmem:[#allocation5 + $0x2a4] ss:$16 sps:$4 sm:$0xff]  }
  0x56   :  { %1245 = vmatpush1.bf16.msra.mxu0 %v2274_v30  ;;  %1374 = vmatpush1.bf16.msra.mxu1 %v2275_v31  ;;  %v2359_v27 = vld [vmem:[#allocation5 + $0x2ac] ss:$16 sps:$4 sm:$0xff]   ;;  %v2354_v28 = vld [vmem:[#allocation5 + $0x2a0] ss:$16 sps:$4 sm:$0xff]   ;;  %v2357_v29 = vld [vmem:[#allocation5 + $0x2a8] ss:$16 sps:$4 sm:$0xff]  }
  0x57   :  { %1246 = vmatprep.subr.bf16.mxu0 %v2276_v32  ;;  %1375 = vmatprep.subr.bf16.mxu1 %v2278_v33  ;;  %v2362_v30 = vld [vmem:[#allocation5 + $0x2c4] ss:$16 sps:$4 sm:$0xff]   ;;  %v2365_v31 = vld [vmem:[#allocation5 + $0x2cc] ss:$16 sps:$4 sm:$0xff]   ;;  %v2378_v47 = vld [vmem:[#allocation5 + $0x320] ss:$16 sps:$4 sm:$0xff]  }
  0x58   :  { %v63_v32 = vld [vmem:[#allocation2 + $0x18] sm:$0xff]  ;;  %v69_v33 = vld [vmem:[#allocation2 + $0x48] sm:$0xff]  ;;  %v2416_v5 = vld [vmem:[#allocation5 + $0x3e4] ss:$16 sps:$4 sm:$0xff]   ;;  %s2614_s6 = scalar_lea.vmem %s1924_s5, 32 }
  0x59   :  { %v2383_v46 = vld [vmem:[#allocation5 + $0x32c] ss:$16 sps:$4 sm:$0xff]   ;;  %v2411_v4 = vld [vmem:[#allocation5 + $0x3c8] ss:$16 sps:$4 sm:$0xff]   ;;  %p2615_p10 = scmp.ne.s32.totalorder %s1924_s5, %s2614_s6  ;;  %p2620_p12 = scmp.lt.s32.totalorder %s2614_s6, %s2614_s6 }
  0x5a   :  { %1247 = vmatpush1.bf16.msra.mxu0 %v2280_v34  ;;  %1376 = vmatpush1.bf16.msra.mxu1 %v2281_v35  ;;  %v2360_v34 = vld [vmem:[#allocation5 + $0x2c0] ss:$16 sps:$4 sm:$0xff]   ;;  %v2363_v35 = vld [vmem:[#allocation5 + $0x2c8] ss:$16 sps:$4 sm:$0xff]   ;;  %v2389_v50 = vld [vmem:[#allocation5 + $0x34c] ss:$16 sps:$4 sm:$0xff]  }
  0x5b   :  { %1248 = vmatprep.subr.bf16.mxu0 %v2282_v36  ;;  %1377 = vmatprep.subr.bf16.mxu1 %v2284_v37  ;;  %v75_v36 = vpack.c.bf16 %v69_v33, %v63_v32  ;;  %v2368_v37 = vld [vmem:[#allocation5 + $0x2e4] ss:$16 sps:$4 sm:$0xff]   ;;  %v2449_v32 = vld [vmem:[#allocation5 + $0x48c] ss:$16 sps:$4 sm:$0xff]   ;;  %v2444_v33 = vld [vmem:[#allocation5 + $0x480] ss:$16 sps:$4 sm:$0xff]   ;;  %p2621_p13 = por %p2620_p12, %p2619_p11 }
  0x5d   :  { %p2622_p0 = pnand %p2621_p13, %p2615_p10 }
  0x5e   :  { %1249 = vmatpush1.bf16.msra.mxu0 %v2286_v38  ;;  %1378 = vmatpush1.bf16.msra.mxu1 %v2287_v39  ;;  %v2371_v38 = vld [vmem:[#allocation5 + $0x2ec] ss:$16 sps:$4 sm:$0xff]   ;;  %v2366_v39 = vld [vmem:[#allocation5 + $0x2e0] ss:$16 sps:$4 sm:$0xff]  }
  0x5f   :  { %1250 = vmatprep.subr.bf16.mxu0 %v2288_v40  ;;  %1379 = vmatprep.subr.bf16.mxu1 %v2290_v41  ;;  %v2369_v40 = vld [vmem:[#allocation5 + $0x2e8] ss:$16 sps:$4 sm:$0xff]   ;;  %v2374_v41 = vld [vmem:[#allocation5 + $0x304] ss:$16 sps:$4 sm:$0xff]  }
  0x62   :  { %1251 = vmatpush1.bf16.msra.mxu0 %v2292_v42  ;;  %1380 = vmatpush1.bf16.msra.mxu1 %v2293_v43  ;;  %v2377_v42 = vld [vmem:[#allocation5 + $0x30c] ss:$16 sps:$4 sm:$0xff]   ;;  %v2372_v43 = vld [vmem:[#allocation5 + $0x300] ss:$16 sps:$4 sm:$0xff]  }
  0x63   :  { %1252 = vmatprep.subr.bf16.mxu0 %v2294_v44  ;;  %1381 = vmatprep.subr.bf16.mxu1 %v2296_v45  ;;  %v2375_v44 = vld [vmem:[#allocation5 + $0x308] ss:$16 sps:$4 sm:$0xff]   ;;  %v2380_v45 = vld [vmem:[#allocation5 + $0x324] ss:$16 sps:$4 sm:$0xff]  }
  0x66   :  { %1253 = vmatpush1.bf16.msra.mxu0 %v2298_v48  ;;  %1382 = vmatpush1.bf16.msra.mxu1 %v2299_v49  ;;  %v2381_v48 = vld [vmem:[#allocation5 + $0x328] ss:$16 sps:$4 sm:$0xff]   ;;  %v2386_v49 = vld [vmem:[#allocation5 + $0x344] ss:$16 sps:$4 sm:$0xff]  }
  0x67   :  { %1254 = vmatprep.subr.bf16.mxu0 %v2300_v51  ;;  %1383 = vmatprep.subr.bf16.mxu1 %v2302_v52  ;;  %v2384_v51 = vld [vmem:[#allocation5 + $0x340] ss:$16 sps:$4 sm:$0xff]   ;;  %v2387_v52 = vld [vmem:[#allocation5 + $0x348] ss:$16 sps:$4 sm:$0xff]  }
  0x6a   :  { %1255 = vmatpush1.bf16.msra.mxu0 %v2304_v53  ;;  %1384 = vmatpush1.bf16.msra.mxu1 %v2305_v54  ;;  %v2392_v53 = vld [vmem:[#allocation5 + $0x364] ss:$16 sps:$4 sm:$0xff]   ;;  %v2395_v54 = vld [vmem:[#allocation5 + $0x36c] ss:$16 sps:$4 sm:$0xff]  }
  0x6b   :  { %1256 = vmatprep.subr.bf16.mxu0 %v2306_v55  ;;  %1385 = vmatprep.subr.bf16.mxu1 %v2308_v56  ;;  %v2390_v55 = vld [vmem:[#allocation5 + $0x360] ss:$16 sps:$4 sm:$0xff]   ;;  %v2393_v56 = vld [vmem:[#allocation5 + $0x368] ss:$16 sps:$4 sm:$0xff]  }
  0x6e   :  { %1257 = vmatpush1.bf16.msra.mxu0 %v2310_v57  ;;  %1386 = vmatpush1.bf16.msra.mxu1 %v2311_v58  ;;  %v2398_v57 = vld [vmem:[#allocation5 + $0x384] ss:$16 sps:$4 sm:$0xff]   ;;  %v2401_v58 = vld [vmem:[#allocation5 + $0x38c] ss:$16 sps:$4 sm:$0xff]  }
  0x6f   :  { %1258 = vmatprep.subr.bf16.mxu0 %v2312_v59  ;;  %1387 = vmatprep.subr.bf16.mxu1 %v2314_v60  ;;  %v2396_v59 = vld [vmem:[#allocation5 + $0x380] ss:$16 sps:$4 sm:$0xff]   ;;  %v2399_v60 = vld [vmem:[#allocation5 + $0x388] ss:$16 sps:$4 sm:$0xff]  }
  0x72   :  { %1259 = vmatpush1.bf16.msra.mxu0 %v2316_v61  ;;  %1388 = vmatpush1.bf16.msra.mxu1 %v2317_v62  ;;  %v2404_v61 = vld [vmem:[#allocation5 + $0x3a4] ss:$16 sps:$4 sm:$0xff]   ;;  %v2407_v62 = vld [vmem:[#allocation5 + $0x3ac] ss:$16 sps:$4 sm:$0xff]  }
  0x73   :  { %1260 = vmatprep.subr.bf16.mxu0 %v2318_v63  ;;  %1389 = vmatprep.subr.bf16.mxu1 %v2320_v0  ;;  %v2402_v63 = vld [vmem:[#allocation5 + $0x3a0] ss:$16 sps:$4 sm:$0xff]   ;;  %v2405_v0 = vld [vmem:[#allocation5 + $0x3a8] ss:$16 sps:$4 sm:$0xff]  }
  0x76   :  { %1261 = vmatpush1.bf16.msra.mxu0 %v2322_v1  ;;  %1390 = vmatpush1.bf16.msra.mxu1 %v2323_v2  ;;  %v2410_v1 = vld [vmem:[#allocation5 + $0x3c4] ss:$16 sps:$4 sm:$0xff]   ;;  %v2413_v2 = vld [vmem:[#allocation5 + $0x3cc] ss:$16 sps:$4 sm:$0xff]  }
  0x77   :  { %1273 = vmatprep.subr.bf16.mxu0 %v2326_v3  ;;  %1402 = vmatprep.subr.bf16.mxu1 %v2329_v6  ;;  %v2408_v3 = vld [vmem:[#allocation5 + $0x3c0] ss:$16 sps:$4 sm:$0xff]   ;;  %v2419_v6 = vld [vmem:[#allocation5 + $0x3ec] ss:$16 sps:$4 sm:$0xff]  }
  0x79   :  { %1263 = vmatmul.mubr.bf16.vlgmr.msra.gmra.mrb[0].mxu0 %v72_v9  ;;  %1392 = vmatmul.mubr.bf16.vlgmr.msra.gmra.mrb[0].mxu1 %v72_v9  ;;  %v2422_v9 = vld [vmem:[#allocation5 + $0x404] ss:$16 sps:$4 sm:$0xff]  }
  0x7a   :  { %1274 = vmatpush1.bf16.msra.mxu0 %v2324_v7  ;;  %1403 = vmatpush1.bf16.msra.mxu1 %v2327_v8  ;;  %v2414_v7 = vld [vmem:[#allocation5 + $0x3e0] ss:$16 sps:$4 sm:$0xff]   ;;  %v2417_v8 = vld [vmem:[#allocation5 + $0x3e8] ss:$16 sps:$4 sm:$0xff]  }
  0x7b   :  { %1275 = vmatprep.subr.bf16.mxu0 %v2332_v10  ;;  %1404 = vmatprep.subr.bf16.mxu1 %v2335_v11  ;;  %v62_v10 = vld [vmem:[#allocation2 + $0x10] sm:$0xff]  ;;  %v68_v11 = vld [vmem:[#allocation2 + $0x40] sm:$0xff] }
  0x7c   :  { %1305 = vmatprep.mubr.bf16.mxu0 %v75_v36  ;;  %1434 = vmatprep.mubr.bf16.mxu1 %v75_v36  ;;  %v2455_v36 = vld [vmem:[#allocation5 + $0x4ac] ss:$16 sps:$4 sm:$0xff]  }
  0x7e   :  { %1276 = vmatpush1.bf16.msra.mxu0 %v2330_v12  ;;  %1405 = vmatpush1.bf16.msra.mxu1 %v2333_v13  ;;  %v2425_v12 = vld [vmem:[#allocation5 + $0x40c] ss:$16 sps:$4 sm:$0xff]   ;;  %v2420_v13 = vld [vmem:[#allocation5 + $0x400] ss:$16 sps:$4 sm:$0xff]  }
  0x7f   :  { %1277 = vmatprep.subr.bf16.mxu0 %v2338_v14  ;;  %1406 = vmatprep.subr.bf16.mxu1 %v2341_v15  ;;  %v2423_v14 = vld [vmem:[#allocation5 + $0x408] ss:$16 sps:$4 sm:$0xff]   ;;  %v74_v15 = vpack.c.bf16 %v68_v11, %v62_v10  ;;  %v2512_v11 = vld [vmem:[#allocation5 + $0x5e4] ss:$16 sps:$4 sm:$0xff]  }
  0x80   :  { %v2507_v10 = vld [vmem:[#allocation5 + $0x5c8] ss:$16 sps:$4 sm:$0xff]  }
  0x82   :  { %1278 = vmatpush1.bf16.msra.mxu0 %v2336_v16  ;;  %1407 = vmatpush1.bf16.msra.mxu1 %v2339_v17  ;;  %v2428_v16 = vld [vmem:[#allocation5 + $0x424] ss:$16 sps:$4 sm:$0xff]   ;;  %v2431_v17 = vld [vmem:[#allocation5 + $0x42c] ss:$16 sps:$4 sm:$0xff]  }
  0x83   :  { %1279 = vmatprep.subr.bf16.mxu0 %v2344_v18  ;;  %1408 = vmatprep.subr.bf16.mxu1 %v2347_v19  ;;  %v65_v18 = vld [vmem:[#allocation2 + $0x28] sm:$0xff]  ;;  %v2426_v19 = vld [vmem:[#allocation5 + $0x420] ss:$16 sps:$4 sm:$0xff]  }
  0x86   :  { %1280 = vmatpush1.bf16.msra.mxu0 %v2342_v20  ;;  %1409 = vmatpush1.bf16.msra.mxu1 %v2345_v21  ;;  %v2429_v20 = vld [vmem:[#allocation5 + $0x428] ss:$16 sps:$4 sm:$0xff]  }
  0x87   :  { %1281 = vmatprep.subr.bf16.mxu0 %v2350_v22  ;;  %1410 = vmatprep.subr.bf16.mxu1 %v2353_v23  ;;  %v71_v21 = vld [vmem:[#allocation2 + $0x58] sm:$0xff]  ;;  %v2434_v22 = vld [vmem:[#allocation5 + $0x444] ss:$16 sps:$4 sm:$0xff]  }
  0x88   :  { %v77_v23 = vpack.c.bf16 %v71_v21, %v65_v18  ;;  %v2517_v18 = vld [vmem:[#allocation7 + $0xc0] sm:$0xff]  }
  0x89   :  { %v2519_v21 = vld [vmem:[#allocation7 + $0x80] sm:$0xff]  }
  0x8a   :  { %1282 = vmatpush1.bf16.msra.mxu0 %v2348_v24  ;;  %1411 = vmatpush1.bf16.msra.mxu1 %v2351_v25  ;;  %v2437_v24 = vld [vmem:[#allocation5 + $0x44c] ss:$16 sps:$4 sm:$0xff]   ;;  %v2432_v25 = vld [vmem:[#allocation5 + $0x440] ss:$16 sps:$4 sm:$0xff]  }
  0x8b   :  { %1283 = vmatprep.subr.bf16.mxu0 %v2356_v26  ;;  %1412 = vmatprep.subr.bf16.mxu1 %v2359_v27  ;;  %v2435_v26 = vld [vmem:[#allocation5 + $0x448] ss:$16 sps:$4 sm:$0xff]   ;;  %v2440_v27 = vld [vmem:[#allocation5 + $0x464] ss:$16 sps:$4 sm:$0xff]  }
  0x8e   :  { %1284 = vmatpush1.bf16.msra.mxu0 %v2354_v28  ;;  %1413 = vmatpush1.bf16.msra.mxu1 %v2357_v29  ;;  %v2443_v28 = vld [vmem:[#allocation5 + $0x46c] ss:$16 sps:$4 sm:$0xff]   ;;  %v2438_v29 = vld [vmem:[#allocation5 + $0x460] ss:$16 sps:$4 sm:$0xff]  }
  0x8f   :  { %1285 = vmatprep.subr.bf16.mxu0 %v2362_v30  ;;  %1414 = vmatprep.subr.bf16.mxu1 %v2365_v31  ;;  %v2441_v30 = vld [vmem:[#allocation5 + $0x468] ss:$16 sps:$4 sm:$0xff]   ;;  %v2446_v31 = vld [vmem:[#allocation5 + $0x484] ss:$16 sps:$4 sm:$0xff]  }
  0x92   :  { %1286 = vmatpush1.bf16.msra.mxu0 %v2360_v34  ;;  %1415 = vmatpush1.bf16.msra.mxu1 %v2363_v35  ;;  %v2447_v34 = vld [vmem:[#allocation5 + $0x488] ss:$16 sps:$4 sm:$0xff]   ;;  %v2452_v35 = vld [vmem:[#allocation5 + $0x4a4] ss:$16 sps:$4 sm:$0xff]  }
  0x93   :  { %1287 = vmatprep.subr.bf16.mxu0 %v2368_v37  ;;  %1416 = vmatprep.subr.bf16.mxu1 %v2371_v38  ;;  %v2450_v37 = vld [vmem:[#allocation5 + $0x4a0] ss:$16 sps:$4 sm:$0xff]   ;;  %v2453_v38 = vld [vmem:[#allocation5 + $0x4a8] ss:$16 sps:$4 sm:$0xff]  }
  0x96   :  { %1288 = vmatpush1.bf16.msra.mxu0 %v2366_v39  ;;  %1417 = vmatpush1.bf16.msra.mxu1 %v2369_v40  ;;  %v2458_v39 = vld [vmem:[#allocation5 + $0x4c4] ss:$16 sps:$4 sm:$0xff]   ;;  %v2461_v40 = vld [vmem:[#allocation5 + $0x4cc] ss:$16 sps:$4 sm:$0xff]  }
  0x97   :  { %1289 = vmatprep.subr.bf16.mxu0 %v2374_v41  ;;  %1418 = vmatprep.subr.bf16.mxu1 %v2377_v42  ;;  %v2456_v41 = vld [vmem:[#allocation5 + $0x4c0] ss:$16 sps:$4 sm:$0xff]   ;;  %v2459_v42 = vld [vmem:[#allocation5 + $0x4c8] ss:$16 sps:$4 sm:$0xff]  }
  0x9a   :  { %1290 = vmatpush1.bf16.msra.mxu0 %v2372_v43  ;;  %1419 = vmatpush1.bf16.msra.mxu1 %v2375_v44  ;;  %v2464_v43 = vld [vmem:[#allocation5 + $0x4e4] ss:$16 sps:$4 sm:$0xff]   ;;  %v2467_v44 = vld [vmem:[#allocation5 + $0x4ec] ss:$16 sps:$4 sm:$0xff]  }
  0x9b   :  { %1291 = vmatprep.subr.bf16.mxu0 %v2380_v45  ;;  %1420 = vmatprep.subr.bf16.mxu1 %v2383_v46  ;;  %v2462_v45 = vld [vmem:[#allocation5 + $0x4e0] ss:$16 sps:$4 sm:$0xff]   ;;  %v2465_v46 = vld [vmem:[#allocation5 + $0x4e8] ss:$16 sps:$4 sm:$0xff]  }
  0x9e   :  { %1292 = vmatpush1.bf16.msra.mxu0 %v2378_v47  ;;  %1421 = vmatpush1.bf16.msra.mxu1 %v2381_v48  ;;  %v2470_v47 = vld [vmem:[#allocation5 + $0x504] ss:$16 sps:$4 sm:$0xff]   ;;  %v2473_v48 = vld [vmem:[#allocation5 + $0x50c] ss:$16 sps:$4 sm:$0xff]  }
  0x9f   :  { %1293 = vmatprep.subr.bf16.mxu0 %v2386_v49  ;;  %1422 = vmatprep.subr.bf16.mxu1 %v2389_v50  ;;  %v2468_v49 = vld [vmem:[#allocation5 + $0x500] ss:$16 sps:$4 sm:$0xff]   ;;  %v2471_v50 = vld [vmem:[#allocation5 + $0x508] ss:$16 sps:$4 sm:$0xff]  }
  0xa2   :  { %1294 = vmatpush1.bf16.msra.mxu0 %v2384_v51  ;;  %1423 = vmatpush1.bf16.msra.mxu1 %v2387_v52  ;;  %v2476_v51 = vld [vmem:[#allocation5 + $0x524] ss:$16 sps:$4 sm:$0xff]   ;;  %v2479_v52 = vld [vmem:[#allocation5 + $0x52c] ss:$16 sps:$4 sm:$0xff]  }
  0xa3   :  { %1295 = vmatprep.subr.bf16.mxu0 %v2392_v53  ;;  %1424 = vmatprep.subr.bf16.mxu1 %v2395_v54  ;;  %v2474_v53 = vld [vmem:[#allocation5 + $0x520] ss:$16 sps:$4 sm:$0xff]   ;;  %v2477_v54 = vld [vmem:[#allocation5 + $0x528] ss:$16 sps:$4 sm:$0xff]  }
  0xa6   :  { %1296 = vmatpush1.bf16.msra.mxu0 %v2390_v55  ;;  %1425 = vmatpush1.bf16.msra.mxu1 %v2393_v56  ;;  %v2482_v55 = vld [vmem:[#allocation5 + $0x544] ss:$16 sps:$4 sm:$0xff]   ;;  %v2485_v56 = vld [vmem:[#allocation5 + $0x54c] ss:$16 sps:$4 sm:$0xff]  }
  0xa7   :  { %1297 = vmatprep.subr.bf16.mxu0 %v2398_v57  ;;  %1426 = vmatprep.subr.bf16.mxu1 %v2401_v58  ;;  %v2480_v57 = vld [vmem:[#allocation5 + $0x540] ss:$16 sps:$4 sm:$0xff]   ;;  %v2483_v58 = vld [vmem:[#allocation5 + $0x548] ss:$16 sps:$4 sm:$0xff]  }
  0xaa   :  { %1298 = vmatpush1.bf16.msra.mxu0 %v2396_v59  ;;  %1427 = vmatpush1.bf16.msra.mxu1 %v2399_v60  ;;  %v2488_v59 = vld [vmem:[#allocation5 + $0x564] ss:$16 sps:$4 sm:$0xff]   ;;  %v2491_v60 = vld [vmem:[#allocation5 + $0x56c] ss:$16 sps:$4 sm:$0xff]  }
  0xab   :  { %1299 = vmatprep.subr.bf16.mxu0 %v2404_v61  ;;  %1428 = vmatprep.subr.bf16.mxu1 %v2407_v62  ;;  %v2486_v61 = vld [vmem:[#allocation5 + $0x560] ss:$16 sps:$4 sm:$0xff]   ;;  %v2489_v62 = vld [vmem:[#allocation5 + $0x568] ss:$16 sps:$4 sm:$0xff]  }
  0xae   :  { %1300 = vmatpush1.bf16.msra.mxu0 %v2402_v63  ;;  %1429 = vmatpush1.bf16.msra.mxu1 %v2405_v0  ;;  %v2494_v63 = vld [vmem:[#allocation5 + $0x584] ss:$16 sps:$4 sm:$0xff]   ;;  %v2497_v0 = vld [vmem:[#allocation5 + $0x58c] ss:$16 sps:$4 sm:$0xff]  }
  0xaf   :  { %1301 = vmatprep.subr.bf16.mxu0 %v2410_v1  ;;  %1430 = vmatprep.subr.bf16.mxu1 %v2413_v2  ;;  %v2492_v1 = vld [vmem:[#allocation5 + $0x580] ss:$16 sps:$4 sm:$0xff]   ;;  %v2495_v2 = vld [vmem:[#allocation5 + $0x588] ss:$16 sps:$4 sm:$0xff]  }
  0xb2   :  { %1302 = vmatpush1.bf16.msra.mxu0 %v2408_v3  ;;  %1431 = vmatpush1.bf16.msra.mxu1 %v2411_v4  ;;  %v2500_v3 = vld [vmem:[#allocation5 + $0x5a4] ss:$16 sps:$4 sm:$0xff]   ;;  %v2503_v4 = vld [vmem:[#allocation5 + $0x5ac] ss:$16 sps:$4 sm:$0xff]  }
  0xb3   :  { %1303 = vmatprep.subr.bf16.mxu0 %v2416_v5  ;;  %1432 = vmatprep.subr.bf16.mxu1 %v2419_v6  ;;  %v2498_v5 = vld [vmem:[#allocation5 + $0x5a0] ss:$16 sps:$4 sm:$0xff]   ;;  %v2501_v6 = vld [vmem:[#allocation5 + $0x5a8] ss:$16 sps:$4 sm:$0xff]  }
  0xb6   :  { %1304 = vmatpush1.bf16.msra.mxu0 %v2414_v7  ;;  %1433 = vmatpush1.bf16.msra.mxu1 %v2417_v8  ;;  %v2506_v7 = vld [vmem:[#allocation5 + $0x5c4] ss:$16 sps:$4 sm:$0xff]   ;;  %v2509_v8 = vld [vmem:[#allocation5 + $0x5cc] ss:$16 sps:$4 sm:$0xff]  }
  0xb7   :  { %1316 = vmatprep.subr.bf16.mxu0 %v2422_v9  ;;  %1445 = vmatprep.subr.bf16.mxu1 %v2425_v12  ;;  %v2504_v9 = vld [vmem:[#allocation5 + $0x5c0] ss:$16 sps:$4 sm:$0xff]   ;;  %v2515_v12 = vld [vmem:[#allocation5 + $0x5ec] ss:$16 sps:$4 sm:$0xff]  }
  0xb9   :  { %1306 = vmatmul.mubr.bf16.vlgmr.msra.gmra.mrb[0].mxu0 %v74_v15  ;;  %1435 = vmatmul.mubr.bf16.vlgmr.msra.gmra.mrb[0].mxu1 %v74_v15  ;;  %v64_v15 = vld [vmem:[#allocation2 + $0x20] sm:$0xff] }
  0xba   :  { %1317 = vmatpush1.bf16.msra.mxu0 %v2420_v13  ;;  %1446 = vmatpush1.bf16.msra.mxu1 %v2423_v14  ;;  %v2510_v13 = vld [vmem:[#allocation5 + $0x5e0] ss:$16 sps:$4 sm:$0xff]   ;;  %v2513_v14 = vld [vmem:[#allocation5 + $0x5e8] ss:$16 sps:$4 sm:$0xff]  }
  0xbb   :  { %1318 = vmatprep.subr.bf16.mxu0 %v2428_v16  ;;  %1447 = vmatprep.subr.bf16.mxu1 %v2431_v17  ;;  %v70_v16 = vld [vmem:[#allocation2 + $0x50] sm:$0xff]  ;;  %v2516_v17 = vld [vmem:[#allocation7 + $0x40] sm:$0xff]  }
  0xbc   :  { %1348 = vmatprep.mubr.bf16.mxu0 %v77_v23  ;;  %1477 = vmatprep.mubr.bf16.mxu1 %v77_v23  ;;  %v2521_v23 = vld [vmem:[#allocation7 + $0xc8] sm:$0xff]  }
  0xbe   :  { %1319 = vmatpush1.bf16.msra.mxu0 %v2426_v19  ;;  %1448 = vmatpush1.bf16.msra.mxu1 %v2429_v20  ;;  %v76_v19 = vpack.c.bf16 %v70_v16, %v64_v15  ;;  %v2518_v20 = vld [vmem:[#allocation7] sm:$0xff]  }
  0xbf   :  { %1320 = vmatprep.subr.bf16.mxu0 %v2434_v22  ;;  %1449 = vmatprep.subr.bf16.mxu1 %v2437_v24  ;;  %v2520_v22 = vld [vmem:[#allocation7 + $0x48] sm:$0xff]  }
  0xc0   :  { %v2522_v24 = vld [vmem:[#allocation7 + $0x8] sm:$0xff]  }
  0xc2   :  { %1321 = vmatpush1.bf16.msra.mxu0 %v2432_v25  ;;  %1450 = vmatpush1.bf16.msra.mxu1 %v2435_v26  ;;  %v2523_v25 = vld [vmem:[#allocation7 + $0x88] sm:$0xff]   ;;  %v2524_v26 = vld [vmem:[#allocation7 + $0x50] sm:$0xff]  }
  0xc3   :  { %1322 = vmatprep.subr.bf16.mxu0 %v2440_v27  ;;  %1451 = vmatprep.subr.bf16.mxu1 %v2443_v28  ;;  %v2525_v27 = vld [vmem:[#allocation7 + $0xd0] sm:$0xff]  }
  0xc4   :  { %v2526_v28 = vld [vmem:[#allocation7 + $0x10] sm:$0xff]  }
  0xc6   :  { %1323 = vmatpush1.bf16.msra.mxu0 %v2438_v29  ;;  %1452 = vmatpush1.bf16.msra.mxu1 %v2441_v30  ;;  %v2527_v29 = vld [vmem:[#allocation7 + $0x90] sm:$0xff]   ;;  %v2528_v30 = vld [vmem:[#allocation7 + $0x58] sm:$0xff]  }
  0xc7   :  { %1324 = vmatprep.subr.bf16.mxu0 %v2446_v31  ;;  %1453 = vmatprep.subr.bf16.mxu1 %v2449_v32  ;;  %v2529_v31 = vld [vmem:[#allocation7 + $0xd8] sm:$0xff]  }
  0xc8   :  { %v2530_v32 = vld [vmem:[#allocation7 + $0x18] sm:$0xff]  }
  0xca   :  { %1325 = vmatpush1.bf16.msra.mxu0 %v2444_v33  ;;  %1454 = vmatpush1.bf16.msra.mxu1 %v2447_v34  ;;  %v2531_v33 = vld [vmem:[#allocation7 + $0x98] sm:$0xff]   ;;  %v2532_v34 = vld [vmem:[#allocation7 + $0x60] sm:$0xff]  }
  0xcb   :  { %1326 = vmatprep.subr.bf16.mxu0 %v2452_v35  ;;  %1455 = vmatprep.subr.bf16.mxu1 %v2455_v36  ;;  %v2533_v35 = vld [vmem:[#allocation7 + $0xe0] sm:$0xff]  }
  0xcc   :  { %v2534_v36 = vld [vmem:[#allocation7 + $0x20] sm:$0xff]  }
  0xce   :  { %1327 = vmatpush1.bf16.msra.mxu0 %v2450_v37  ;;  %1456 = vmatpush1.bf16.msra.mxu1 %v2453_v38  ;;  %v2535_v37 = vld [vmem:[#allocation7 + $0xa0] sm:$0xff]   ;;  %v2536_v38 = vld [vmem:[#allocation7 + $0x68] sm:$0xff]  }
  0xcf   :  { %1328 = vmatprep.subr.bf16.mxu0 %v2458_v39  ;;  %1457 = vmatprep.subr.bf16.mxu1 %v2461_v40  ;;  %v2537_v39 = vld [vmem:[#allocation7 + $0xe8] sm:$0xff]  }
  0xd0   :  { %v2538_v40 = vld [vmem:[#allocation7 + $0x28] sm:$0xff]  }
  0xd2   :  { %1329 = vmatpush1.bf16.msra.mxu0 %v2456_v41  ;;  %1458 = vmatpush1.bf16.msra.mxu1 %v2459_v42  ;;  %v2539_v41 = vld [vmem:[#allocation7 + $0xa8] sm:$0xff]   ;;  %v2540_v42 = vld [vmem:[#allocation7 + $0x70] sm:$0xff]  }
  0xd3   :  { %1330 = vmatprep.subr.bf16.mxu0 %v2464_v43  ;;  %1459 = vmatprep.subr.bf16.mxu1 %v2467_v44  ;;  %v2541_v43 = vld [vmem:[#allocation7 + $0xf0] sm:$0xff]  }
  0xd4   :  { %v2542_v44 = vld [vmem:[#allocation7 + $0x30] sm:$0xff]  }
  0xd6   :  { %1331 = vmatpush1.bf16.msra.mxu0 %v2462_v45  ;;  %1460 = vmatpush1.bf16.msra.mxu1 %v2465_v46  ;;  %v2543_v45 = vld [vmem:[#allocation7 + $0xb0] sm:$0xff]   ;;  %v2544_v46 = vld [vmem:[#allocation7 + $0x78] sm:$0xff]  }
  0xd7   :  { %1332 = vmatprep.subr.bf16.mxu0 %v2470_v47  ;;  %1461 = vmatprep.subr.bf16.mxu1 %v2473_v48  ;;  %v2545_v47 = vld [vmem:[#allocation7 + $0xf8] sm:$0xff]  }
  0xd8   :  { %v2546_v48 = vld [vmem:[#allocation7 + $0x38] sm:$0xff]  }
  0xda   :  { %1333 = vmatpush1.bf16.msra.mxu0 %v2468_v49  ;;  %1462 = vmatpush1.bf16.msra.mxu1 %v2471_v50  ;;  %v2547_v49 = vld [vmem:[#allocation7 + $0xb8] sm:$0xff]  }
  0xdb   :  { %1334 = vmatprep.subr.bf16.mxu0 %v2476_v51  ;;  %1463 = vmatprep.subr.bf16.mxu1 %v2479_v52 }
  0xde   :  { %1335 = vmatpush1.bf16.msra.mxu0 %v2474_v53  ;;  %1464 = vmatpush1.bf16.msra.mxu1 %v2477_v54 }
  0xdf   :  { %1336 = vmatprep.subr.bf16.mxu0 %v2482_v55  ;;  %1465 = vmatprep.subr.bf16.mxu1 %v2485_v56 }
  0xe2   :  { %1337 = vmatpush1.bf16.msra.mxu0 %v2480_v57  ;;  %1466 = vmatpush1.bf16.msra.mxu1 %v2483_v58 }
  0xe3   :  { %1338 = vmatprep.subr.bf16.mxu0 %v2488_v59  ;;  %1467 = vmatprep.subr.bf16.mxu1 %v2491_v60 }
  0xe6   :  { %1339 = vmatpush1.bf16.msra.mxu0 %v2486_v61  ;;  %1468 = vmatpush1.bf16.msra.mxu1 %v2489_v62 }
  0xe7   :  { %1340 = vmatprep.subr.bf16.mxu0 %v2494_v63  ;;  %1469 = vmatprep.subr.bf16.mxu1 %v2497_v0 }
  0xea   :  { %1341 = vmatpush1.bf16.msra.mxu0 %v2492_v1  ;;  %1470 = vmatpush1.bf16.msra.mxu1 %v2495_v2 }
  0xeb   :  { %1342 = vmatprep.subr.bf16.mxu0 %v2500_v3  ;;  %1471 = vmatprep.subr.bf16.mxu1 %v2503_v4 }
  0xee   :  { %1343 = vmatpush1.bf16.msra.mxu0 %v2498_v5  ;;  %1472 = vmatpush1.bf16.msra.mxu1 %v2501_v6 }
  0xef   :  { %1344 = vmatprep.subr.bf16.mxu0 %v2506_v7  ;;  %1473 = vmatprep.subr.bf16.mxu1 %v2509_v8 }
  0xf2   :  { %1345 = vmatpush1.bf16.msra.mxu0 %v2504_v9  ;;  %1474 = vmatpush1.bf16.msra.mxu1 %v2507_v10 }
  0xf3   :  { %1346 = vmatprep.subr.bf16.mxu0 %v2512_v11  ;;  %1475 = vmatprep.subr.bf16.mxu1 %v2515_v12 }
  0xf6   :  { %1347 = vmatpush1.bf16.msra.mxu0 %v2510_v13  ;;  %1476 = vmatpush1.bf16.msra.mxu1 %v2513_v14 }
  0xf7   :  { %2158 = vmatprep.subr.bf16.mxu0 %v2516_v17  ;;  %2180 = vmatprep.subr.bf16.mxu1 %v2517_v18 }
  0xf9   :  { %1349 = vmatmul.mubr.bf16.vlgmr.msra.gmra.mrb[0].mxu0 %v76_v19  ;;  %1478 = vmatmul.mubr.bf16.vlgmr.msra.gmra.mrb[0].mxu1 %v76_v19 }
  0xfa   :  { %2159 = vmatpush3.bf16.msra.mxu0 %v2518_v20  ;;  %2181 = vmatpush3.bf16.msra.mxu1 %v2519_v21 }
  0xfb   :  { %2160 = vmatprep.subr.bf16.mxu0 %v2520_v22  ;;  %2182 = vmatprep.subr.bf16.mxu1 %v2521_v23 }
  0xfe   :  { %2161 = vmatpush3.bf16.msra.mxu0 %v2522_v24  ;;  %2183 = vmatpush3.bf16.msra.mxu1 %v2523_v25 }
  0xff   :  { %2162 = vmatprep.subr.bf16.mxu0 %v2524_v26  ;;  %2184 = vmatprep.subr.bf16.mxu1 %v2525_v27 }
 0x102   :  { %2163 = vmatpush3.bf16.msra.mxu0 %v2526_v28  ;;  %2185 = vmatpush3.bf16.msra.mxu1 %v2527_v29 }
 0x103   :  { %2164 = vmatprep.subr.bf16.mxu0 %v2528_v30  ;;  %2186 = vmatprep.subr.bf16.mxu1 %v2529_v31 }
 0x106   :  { %2165 = vmatpush3.bf16.msra.mxu0 %v2530_v32  ;;  %2187 = vmatpush3.bf16.msra.mxu1 %v2531_v33 }
 0x107   :  { %2166 = vmatprep.subr.bf16.mxu0 %v2532_v34  ;;  %2188 = vmatprep.subr.bf16.mxu1 %v2533_v35 }
 0x10a   :  { %2167 = vmatpush3.bf16.msra.mxu0 %v2534_v36  ;;  %2189 = vmatpush3.bf16.msra.mxu1 %v2535_v37 }
 0x10b   :  { %2168 = vmatprep.subr.bf16.mxu0 %v2536_v38  ;;  %2190 = vmatprep.subr.bf16.mxu1 %v2537_v39 }
 0x10e   :  { %2169 = vmatpush3.bf16.msra.mxu0 %v2538_v40  ;;  %2191 = vmatpush3.bf16.msra.mxu1 %v2539_v41 }
 0x10f   :  { %2170 = vmatprep.subr.bf16.mxu0 %v2540_v42  ;;  %2192 = vmatprep.subr.bf16.mxu1 %v2541_v43 }
 0x112   :  { %2171 = vmatpush3.bf16.msra.mxu0 %v2542_v44  ;;  %2193 = vmatpush3.bf16.msra.mxu1 %v2543_v45 }
 0x113   :  { %2172 = vmatprep.subr.bf16.mxu0 %v2544_v46  ;;  %2194 = vmatprep.subr.bf16.mxu1 %v2545_v47 }
 0x116   :  { %2173 = vmatpush3.bf16.msra.mxu0 %v2546_v48  ;;  %2195 = vmatpush3.bf16.msra.mxu1 %v2547_v49 }
 0x1cc   :  { %v1350_v50 = vpop.f32.mrb[0].mxu0  ;;  %v1479_v51 = vpop.f32.mrb[0].mxu1 }
 0x1cd   :  { %v1488_v52 = vrot.slane %v1350_v50, 4  ;;  %v1500_v53 = vrot.slane %v1479_v51, 4  ;;  %v1352_v54 = vpop.f32.mrb[1].mxu0  ;;  %v1481_v55 = vpop.f32.mrb[1].mxu1 }
 0x1ce   :  { %v1494_v56 = vrot.slane %v1352_v54, 4  ;;  %v1506_v57 = vrot.slane %v1481_v55, 4  ;;  %v1354_v58 = vpop.f32.mrb[2].mxu0  ;;  %v1483_v59 = vpop.f32.mrb[2].mxu1 }
 0x1cf   :  { %v1489_v60 = vadd.f32 %v1488_v52, %v1350_v50  ;;  %v1501_v61 = vadd.f32 %v1500_v53, %v1479_v51  ;;  %v1512_v62 = vrot.slane %v1354_v58, 4  ;;  %v1524_v63 = vrot.slane %v1483_v59, 4  ;;  %v1356_v0 = vpop.f32.mrb[3].mxu0  ;;  %v1485_v1 = vpop.f32.mrb[3].mxu1 }
 0x1d0   :  { %v1495_v2 = vadd.f32 %v1494_v56, %v1352_v54  ;;  %v1507_v3 = vadd.f32 %v1506_v57, %v1481_v55  ;;  %v1518_v4 = vrot.slane %v1356_v0, 4  ;;  %v1530_v5 = vrot.slane %v1485_v1, 4 }
 0x1d1   :  { %v1490_v6 = vrot.slane %v1489_v60, 2  ;;  %v1502_v7 = vrot.slane %v1501_v61, 2  ;;  %v1513_v8 = vadd.f32 %v1512_v62, %v1354_v58  ;;  %v1525_v9 = vadd.f32 %v1524_v63, %v1483_v59 }
 0x1d2   :  { %v1496_v10 = vrot.slane %v1495_v2, 2  ;;  %v1508_v11 = vrot.slane %v1507_v3, 2  ;;  %v1519_v12 = vadd.f32 %v1518_v4, %v1356_v0  ;;  %v1531_v13 = vadd.f32 %v1530_v5, %v1485_v1  ;;  %v2125_v4 = vld [vmem:[%s2731_s3] ss:$0 sm:$0xff] }
 0x1d3   :  { %v1491_v14 = vadd.f32 %v1490_v6, %v1489_v60  ;;  %v1503_v15 = vadd.f32 %v1502_v7, %v1501_v61  ;;  %v1514_v16 = vrot.slane %v1513_v8, 2  ;;  %v1526_v17 = vrot.slane %v1525_v9, 2 }
 0x1d4   :  { %v1497_v18 = vadd.f32 %v1496_v10, %v1495_v2  ;;  %v1509_v19 = vadd.f32 %v1508_v11, %v1507_v3  ;;  %v1520_v20 = vrot.slane %v1519_v12, 2  ;;  %v1532_v21 = vrot.slane %v1531_v13, 2 }
 0x1d5   :  { %v1492_v22 = vrot.slane %v1491_v14, 1  ;;  %v1504_v23 = vrot.slane %v1503_v15, 1  ;;  %v1515_v24 = vadd.f32 %v1514_v16, %v1513_v8  ;;  %v1527_v25 = vadd.f32 %v1526_v17, %v1525_v9 }
 0x1d6   :  { %v1498_v26 = vrot.slane %v1497_v18, 1  ;;  %v1510_v27 = vrot.slane %v1509_v19, 1  ;;  %v1521_v28 = vadd.f32 %v1520_v20, %v1519_v12  ;;  %v1533_v29 = vadd.f32 %v1532_v21, %v1531_v13 }
 0x1d7   :  { %v1493_v30 = vadd.f32 %v1492_v22, %v1491_v14  ;;  %v1505_v31 = vadd.f32 %v1504_v23, %v1503_v15  ;;  %v1516_v32 = vrot.slane %v1515_v24, 1  ;;  %v1528_v33 = vrot.slane %v1527_v25, 1 }
 0x1d8   :  { %v1499_v34 = vadd.f32 %v1498_v26, %v1497_v18  ;;  %v1511_v35 = vadd.f32 %v1510_v27, %v1509_v19  ;;  %v1522_v36 = vrot.slane %v1521_v28, 1  ;;  %v1534_v37 = vrot.slane %v1533_v29, 1 }
 0x1d9   :  { %v1536_v38 = vpack.c.bf16 %v1493_v30, %v1493_v30  ;;  %v1538_v39 = vpack.c.bf16 %v1505_v31, %v1505_v31  ;;  %v1517_v40 = vadd.f32 %v1516_v32, %v1515_v24  ;;  %v1529_v41 = vadd.f32 %v1528_v33, %v1527_v25 }
 0x1da   :  { %v1537_v42 = vpack.c.bf16 %v1499_v34, %v1499_v34  ;;  %v1539_v43 = vpack.c.bf16 %v1511_v35, %v1511_v35  ;;  %v1523_v44 = vadd.f32 %v1522_v36, %v1521_v28  ;;  %v1535_v45 = vadd.f32 %v1534_v37, %v1533_v29 }
 0x1db   :  { %v1540_v46 = vpack.c.bf16 %v1517_v40, %v1517_v40  ;;  %v1542_v47 = vpack.c.bf16 %v1529_v41, %v1529_v41  ;;  %v1623_v50 = vunpack.c.l.b16 %v1536_v38  ;;  %v1625_v51 = vunpack.c.l.b16 %v1538_v39 }
 0x1dc   :  { %v1541_v48 = vpack.c.bf16 %v1523_v44, %v1523_v44  ;;  %v1543_v49 = vpack.c.bf16 %v1535_v45, %v1535_v45  ;;  %v1624_v54 = vunpack.c.l.b16 %v1537_v42  ;;  %v1626_v55 = vunpack.c.l.b16 %v1539_v43 }
 0x1dd   :  { %v1627_v52 = vunpack.c.l.b16 %v1540_v46  ;;  %v1629_v53 = vunpack.c.l.b16 %v1542_v47 }
 0x1de   :  { %v1628_v56 = vunpack.c.l.b16 %v1541_v48  ;;  %v1630_v57 = vunpack.c.l.b16 %v1543_v49 }
 0x1df   :  { %v1632_v58 = vsel %vm1631_vm0, %v1627_v52, %v1623_v50  ;;  %v1634_v59 = vsel %vm1631_vm0, %v1629_v53, %v1625_v51 }
 0x1e0   :  { %v1633_v60 = vsel %vm1631_vm0, %v1628_v56, %v1624_v54  ;;  %v1635_v61 = vsel %vm1631_vm0, %v1630_v57, %v1626_v55  ;;  %v1636_v0 = vpack.c.b16 %v1632_v58, %v1632_v58  ;;  %v1638_v1 = vpack.c.b16 %v1634_v59, %v1634_v59 }
 0x1e1   :  { %v1637_v62 = vpack.c.b16 %v1633_v60, %v1633_v60  ;;  %v1639_v63 = vpack.c.b16 %v1635_v61, %v1635_v61 }
 0x1e3   :  { %1868 = vmatprep.mubr.bf16.mxu0 %v1637_v62  ;;  %1908 = vmatprep.mubr.bf16.mxu1 %v1639_v63 }
 0x1e4   :  { %1869 = vmatmul.mubr.bf16.vlgmr.msra.gmra.mrb[4].mxu0 %v1636_v0  ;;  %1909 = vmatmul.mubr.bf16.vlgmr.msra.gmra.mrb[4].mxu1 %v1638_v1 }
 0x2b7   :  { %v2174_v2 = vpop.f32.mrb[4].mxu0  ;;  %v2196_v3 = vpop.f32.mrb[4].mxu1 }
 0x2b8   :  { %v2175_v5 = vpop.f32.mrb[5].mxu0  ;;  %v2197_v6 = vpop.f32.mrb[5].mxu1 }
 0x2b9   :  { %v2176_v7 = vadd.f32 %v2175_v5, %v2174_v2  ;;  %v2198_v8 = vadd.f32 %v2197_v6, %v2196_v3  ;;  %v2177_v9 = vpop.f32.mrb[6].mxu0  ;;  %v2199_v10 = vpop.f32.mrb[6].mxu1 }
 0x2ba   :  { %v2178_v11 = vpop.f32.mrb[7].mxu0  ;;  %v2200_v12 = vpop.f32.mrb[7].mxu1 }
 0x2bb   :  { %v1871_v13 = vadd.f32 %v2176_v7, %v2125_v4 }
 0x2bd   :  { %v1911_v14 = vadd.f32 %v2198_v8, %v1871_v13 }
 0x2bf   :  { %1916 = vst [vmem:[#allocation8] sm:$0x3] %v1911_v14 }
 0x2c0   :  { %2625 = shalt.err (!%p2622_p0)
}
 0x2c1   :  { %s2626_s8 = scalar_lea.hbm %s2732_s4, 32 }
 0x2c2   :  { %p2627_p1 = scmp.ne.s32.totalorder %s2732_s4, %s2626_s8  ;;  %p2630_p2 = scmp.lt.u32.totalorder %s2626_s8, %s2732_s4 }
 0x2c4   :  { %p2632_p3 = pnand %p2630_p2, %p2627_p1 }
 0x2c6   :  { %2635 = shalt.err (!%p2632_p3)
}
 0x2c7   :  { %1926 = dma.vmem_to_hbm [thread:$0]  %s1924_s5, 32, %s2732_s4, [#allocation4]  }
 0x2c8   :  { %2640 = dma.done.wait [#allocation4], 32  }
 0x2c9   :  { %2641 = vsyncadd [#allocation4], 4294967264 }
 0x2ca   :  { %1930 = vsyncpa [#allocation3], 1 }
 0x2cb   :  { %1931 = vsyncpa [#allocation6], 1 }
 0x2cc   :  { %1932 = vsyncpa [#allocation4], 1 }

</bundles_post_ra>
